<compile_context>
chip_gen: v6e
topology: v6e:2x2x1
jax: 0.10.0
libtpu: 0.0.40
codegen_flags: <defaults>
</compile_context>

<pallas_src>
import functools

import jax
import jax.numpy as jnp
from jax.experimental import pallas as pl
from jax.experimental.pallas import tpu as pltpu


LOG_SCALE_MIN = -20.0
LOG_SCALE_MAX = 2.0


def _round_up(x, m):
    return ((x + m - 1) // m) * m


def _mlp_heads_kernel(s_ref, g_ref, w1a_ref, w1b_ref, b1_ref,
                      w2_ref, b2_ref, wh_ref, bh_ref, out_ref,
                      *, state_dim, log_scale_min, log_scale_max):
    # Layer 1: concat(state, goal) @ W1 expressed as two matmuls (no HBM concat).
    h = (jnp.dot(s_ref[...], w1a_ref[...], preferred_element_type=jnp.float32)
         + jnp.dot(g_ref[...], w1b_ref[...], preferred_element_type=jnp.float32)
         + b1_ref[...])
    h = jnp.maximum(h, 0.0).astype(jnp.bfloat16)

    # Layer 2: Linear + ReLU.
    h = jnp.dot(h, w2_ref[...], preferred_element_type=jnp.float32) + b2_ref[...]
    h = jnp.maximum(h, 0.0).astype(jnp.bfloat16)

    # Fused heads: columns = [mean | log_scale | zero-pad], one lane-dense matmul.
    z = jnp.dot(h, wh_ref[...], preferred_element_type=jnp.float32) + bh_ref[...]

    # Columns >= state_dim hold log_scale (+ padding): clamp + exp them.
    col = jax.lax.broadcasted_iota(jnp.int32, z.shape, dimension=1)
    scale = jnp.exp(jnp.clip(z, log_scale_min, log_scale_max))
    out_ref[...] = jnp.where(col >= state_dim, scale, z).astype(out_ref.dtype)


def hierarchy2_forth_forward(state, goal, params, *, tile_b=256):
    """Returns (mean2, scale2). The Laplace distribution is parameterized by these."""
    w1, b1, w2, b2, wm, bm, ws, bs = params
    B, state_dim = state.shape
    h1 = w1.shape[1]
    h2 = w2.shape[1]

    # Batch tile: large (tile_b) for big batches, padded-to-16 for small ones.
    tile = min(tile_b, _round_up(max(B, 1), 16))
    Bp = _round_up(B, tile)
    pad = Bp - B

    s = state.astype(jnp.bfloat16)
    g = goal.astype(jnp.bfloat16)
    if pad:
        s = jnp.pad(s, ((0, pad), (0, 0)))
        g = jnp.pad(g, ((0, pad), (0, 0)))

    # Split the first-layer weight so the HBM concat is not needed.
    w1a = w1[:state_dim].astype(jnp.bfloat16)   # acts on `state`
    w1b = w1[state_dim:].astype(jnp.bfloat16)   # acts on `goal`
    w2b = w2.astype(jnp.bfloat16)

    # Fuse the two heads and pad output columns to a multiple of 128 so the
    # kernel's single output store is full-lane.
    out_cols = max(128, _round_up(2 * state_dim, 128))
    wh = jnp.concatenate([wm, ws], axis=1)                         # (h2, 2*sd)
    wh = jnp.pad(wh, ((0, 0), (0, out_cols - 2 * state_dim))).astype(jnp.bfloat16)
    bh = jnp.concatenate([bm, bs], axis=0)
    bh = jnp.pad(bh, (0, out_cols - 2 * state_dim)).reshape(1, out_cols).astype(jnp.float32)

    b1_2d = b1.reshape(1, h1).astype(jnp.float32)
    b2_2d = b2.reshape(1, h2).astype(jnp.float32)

    kernel = functools.partial(_mlp_heads_kernel, state_dim=state_dim,
                               log_scale_min=LOG_SCALE_MIN,
                               log_scale_max=LOG_SCALE_MAX)

    grid = (Bp // tile,)
    full = lambda i: (0, 0)  # weights / biases are not tiled

    out = pl.pallas_call(
        kernel,
        out_shape=jax.ShapeDtypeStruct((Bp, out_cols), jnp.float32),
        grid_spec=pltpu.PrefetchScalarGridSpec(
            num_scalar_prefetch=0,
            grid=grid,
            in_specs=[
                pl.BlockSpec((tile, state_dim), lambda i: (i, 0)),  # state tile
                pl.BlockSpec((tile, state_dim), lambda i: (i, 0)),  # goal tile
                pl.BlockSpec((state_dim, h1), full),                # w1 (state half)
                pl.BlockSpec((state_dim, h1), full),                # w1 (goal half)
                pl.BlockSpec((1, h1), full),                        # b1
                pl.BlockSpec((h1, h2), full),                       # w2
                pl.BlockSpec((1, h2), full),                        # b2
                pl.BlockSpec((h2, out_cols), full),                 # fused head W
                pl.BlockSpec((1, out_cols), full),                  # fused head b
            ],
            out_specs=pl.BlockSpec((tile, out_cols), lambda i: (i, 0)),
        ),
        compiler_params=pltpu.CompilerParams(
            dimension_semantics=("parallel",)),
    )(s, g, w1a, w1b, b1_2d, w2b, b2_2d, wh, bh)

    mean = out[:B, :state_dim]
    scale = out[:B, state_dim:2 * state_dim]
    return mean, scale


def init_params(key, state_dim, hidden_dims=(256, 256)):
    """Deterministic init mimicking PyTorch nn.Linear (uniform +/- 1/sqrt(fan_in)).
    Weights are stored transposed: (in_features, out_features)."""
    dims_in = [2 * state_dim, hidden_dims[0], hidden_dims[1], hidden_dims[1]]
    dims_out = [hidden_dims[0], hidden_dims[1], state_dim, state_dim]
    params = []
    for d_in, d_out in zip(dims_in, dims_out):
        key, kw, kb = jax.random.split(key, 3)
        bound = 1.0 / jnp.sqrt(jnp.float32(d_in))
        w = jax.random.uniform(kw, (d_in, d_out), jnp.float32, -bound, bound)
        b = jax.random.uniform(kb, (d_out,), jnp.float32, -bound, bound)
        params += [w, b]
    # order: w1,b1 (fc2[0]), w2,b2 (fc2[2]), wm,bm (mean2), ws,bs (log_scale2)
    return tuple(params)


def reference_forward(state, goal, params):
    w1, b1, w2, b2, wm, bm, ws, bs = params
    x = jnp.concatenate([state, goal], axis=-1)
    h = jnp.maximum(x @ w1 + b1, 0.0)
    h = jnp.maximum(h @ w2 + b2, 0.0)
    mean = h @ wm + bm
    scale = jnp.exp(jnp.clip(h @ ws + bs, LOG_SCALE_MIN, LOG_SCALE_MAX))
    return mean, scale


if __name__ == "__main__":
    state_dim = 32
    hidden_dims = (256, 256)
    batch = 8

    key = jax.random.PRNGKey(0)
    kp, ks, kg = jax.random.split(key, 3)
    params = init_params(kp, state_dim, hidden_dims)

    state = jax.random.normal(ks, (batch, state_dim), jnp.float32)
    goal = jax.random.normal(kg, (batch, state_dim), jnp.float32)

    mean, scale = hierarchy2_forth_forward(state, goal, params)
    jax.block_until_ready((mean, scale))

    # sanity check against pure-JAX f32 reference (looser tol: bf16 matmul inputs)
    mean_ref, scale_ref = reference_forward(state, goal, params)
    assert mean.shape == mean_ref.shape and scale.shape == scale_ref.shape
    assert jnp.allclose(mean, mean_ref, atol=5e-2, rtol=5e-2)
    assert jnp.allclose(scale, scale_ref, atol=5e-2, rtol=5e-2)
    assert bool(jnp.all(scale > 0))

    print("KERNEL_OK")
</pallas_src>

<mosaic_0001>
module attributes {stable_mosaic.version = 11 : i64} {
  func.func @_mlp_heads_kernel(%arg0: i32, %arg1: memref<16x32xbf16, #tpu.memory_space<vmem>>, %arg2: memref<16x32xbf16, #tpu.memory_space<vmem>>, %arg3: memref<32x256xbf16, #tpu.memory_space<vmem>>, %arg4: memref<32x256xbf16, #tpu.memory_space<vmem>>, %arg5: memref<1x256xf32, #tpu.memory_space<vmem>>, %arg6: memref<256x256xbf16, #tpu.memory_space<vmem>>, %arg7: memref<1x256xf32, #tpu.memory_space<vmem>>, %arg8: memref<256x128xbf16, #tpu.memory_space<vmem>>, %arg9: memref<1x128xf32, #tpu.memory_space<vmem>>, %arg10: memref<16x128xf32, #tpu.memory_space<vmem>>) attributes {dimension_semantics = [#tpu.dimension_semantics<parallel>], iteration_bounds = array<i64: 1>, scalar_prefetch = 0 : i64, scratch_operands = 0 : i64, tpu.core_type = #tpu.core_type<tc>, window_params = [{transform_indices = @transform_0, window_bounds = array<i64: 16, 32>}, {transform_indices = @transform_1, window_bounds = array<i64: 16, 32>}, {pipeline_mode = #tpu.pipeline_mode<synchronous>, transform_indices = @transform_2, window_bounds = array<i64: 32, 256>}, {pipeline_mode = #tpu.pipeline_mode<synchronous>, transform_indices = @transform_3, window_bounds = array<i64: 32, 256>}, {pipeline_mode = #tpu.pipeline_mode<synchronous>, transform_indices = @transform_4, window_bounds = array<i64: 1, 256>}, {pipeline_mode = #tpu.pipeline_mode<synchronous>, transform_indices = @transform_5, window_bounds = array<i64: 256, 256>}, {pipeline_mode = #tpu.pipeline_mode<synchronous>, transform_indices = @transform_6, window_bounds = array<i64: 1, 256>}, {pipeline_mode = #tpu.pipeline_mode<synchronous>, transform_indices = @transform_7, window_bounds = array<i64: 256, 128>}, {pipeline_mode = #tpu.pipeline_mode<synchronous>, transform_indices = @transform_8, window_bounds = array<i64: 1, 128>}, {transform_indices = @transform_9, window_bounds = array<i64: 16, 128>}]} {
    %c0 = arith.constant 0 : index
    %c0_0 = arith.constant 0 : index
    %0 = vector.load %arg1[%c0, %c0_0] : memref<16x32xbf16, #tpu.memory_space<vmem>>, vector<16x32xbf16>
    %c0_1 = arith.constant 0 : index
    %c0_2 = arith.constant 0 : index
    %1 = vector.load %arg3[%c0_1, %c0_2] : memref<32x256xbf16, #tpu.memory_space<vmem>>, vector<32x256xbf16>
    %cst = arith.constant dense<0.000000e+00> : vector<16x256xf32>
    %2 = tpu.matmul %0, %1, %cst {dimension_numbers = #tpu.dot_dimension_numbers<[1], [0], [0], [1], [0, 0, 1, 1], [], []>} : vector<16x32xbf16>, vector<32x256xbf16>, vector<16x256xf32> -> vector<16x256xf32>
    %c0_3 = arith.constant 0 : index
    %c0_4 = arith.constant 0 : index
    %3 = vector.load %arg2[%c0_3, %c0_4] : memref<16x32xbf16, #tpu.memory_space<vmem>>, vector<16x32xbf16>
    %c0_5 = arith.constant 0 : index
    %c0_6 = arith.constant 0 : index
    %4 = vector.load %arg4[%c0_5, %c0_6] : memref<32x256xbf16, #tpu.memory_space<vmem>>, vector<32x256xbf16>
    %cst_7 = arith.constant dense<0.000000e+00> : vector<16x256xf32>
    %5 = tpu.matmul %3, %4, %cst_7 {dimension_numbers = #tpu.dot_dimension_numbers<[1], [0], [0], [1], [0, 0, 1, 1], [], []>} : vector<16x32xbf16>, vector<32x256xbf16>, vector<16x256xf32> -> vector<16x256xf32>
    %6 = arith.addf %2, %5 : vector<16x256xf32>
    %c0_8 = arith.constant 0 : index
    %c0_9 = arith.constant 0 : index
    %7 = vector.load %arg5[%c0_8, %c0_9] : memref<1x256xf32, #tpu.memory_space<vmem>>, vector<1x256xf32>
    %8 = vector.broadcast %7 : vector<1x256xf32> to vector<16x256xf32>
    %9 = arith.addf %6, %8 : vector<16x256xf32>
    %cst_10 = arith.constant 0.000000e+00 : f32
    %10 = vector.broadcast %cst_10 : f32 to vector<16x256xf32>
    %11 = arith.maximumf %9, %10 : vector<16x256xf32>
    %12 = arith.truncf %11 : vector<16x256xf32> to vector<16x256xbf16>
    %c0_11 = arith.constant 0 : index
    %c0_12 = arith.constant 0 : index
    %13 = vector.load %arg6[%c0_11, %c0_12] : memref<256x256xbf16, #tpu.memory_space<vmem>>, vector<256x256xbf16>
    %cst_13 = arith.constant dense<0.000000e+00> : vector<16x256xf32>
    %14 = tpu.matmul %12, %13, %cst_13 {dimension_numbers = #tpu.dot_dimension_numbers<[1], [0], [0], [1], [0, 0, 1, 1], [], []>} : vector<16x256xbf16>, vector<256x256xbf16>, vector<16x256xf32> -> vector<16x256xf32>
    %c0_14 = arith.constant 0 : index
    %c0_15 = arith.constant 0 : index
    %15 = vector.load %arg7[%c0_14, %c0_15] : memref<1x256xf32, #tpu.memory_space<vmem>>, vector<1x256xf32>
    %16 = vector.broadcast %15 : vector<1x256xf32> to vector<16x256xf32>
    %17 = arith.addf %14, %16 : vector<16x256xf32>
    %cst_16 = arith.constant 0.000000e+00 : f32
    %18 = vector.broadcast %cst_16 : f32 to vector<16x256xf32>
    %19 = arith.maximumf %17, %18 : vector<16x256xf32>
    %20 = arith.truncf %19 : vector<16x256xf32> to vector<16x256xbf16>
    %c0_17 = arith.constant 0 : index
    %c0_18 = arith.constant 0 : index
    %21 = vector.load %arg8[%c0_17, %c0_18] : memref<256x128xbf16, #tpu.memory_space<vmem>>, vector<256x128xbf16>
    %cst_19 = arith.constant dense<0.000000e+00> : vector<16x128xf32>
    %22 = tpu.matmul %20, %21, %cst_19 {dimension_numbers = #tpu.dot_dimension_numbers<[1], [0], [0], [1], [0, 0, 1, 1], [], []>} : vector<16x256xbf16>, vector<256x128xbf16>, vector<16x128xf32> -> vector<16x128xf32>
    %c0_20 = arith.constant 0 : index
    %c0_21 = arith.constant 0 : index
    %23 = vector.load %arg9[%c0_20, %c0_21] : memref<1x128xf32, #tpu.memory_space<vmem>>, vector<1x128xf32>
    %24 = vector.broadcast %23 : vector<1x128xf32> to vector<16x128xf32>
    %25 = arith.addf %22, %24 : vector<16x128xf32>
    %26 = tpu.iota {dimensions = array<i32: 1>} : vector<16x128xi32>
    %cst_22 = arith.constant -2.000000e+01 : f32
    %cst_23 = arith.constant 2.000000e+00 : f32
    %27 = vector.broadcast %cst_22 : f32 to vector<16x128xf32>
    %28 = arith.maximumf %27, %25 : vector<16x128xf32>
    %29 = vector.broadcast %cst_23 : f32 to vector<16x128xf32>
    %30 = arith.minimumf %29, %28 : vector<16x128xf32>
    %31 = math.exp %30 : vector<16x128xf32>
    %c32_i32 = arith.constant 32 : i32
    %32 = vector.broadcast %c32_i32 : i32 to vector<16x128xi32>
    %33 = arith.cmpi sge, %26, %32 : vector<16x128xi32>
    %34 = arith.select %33, %31, %25 : vector<16x128xi1>, vector<16x128xf32>
    %c0_24 = arith.constant 0 : index
    %c0_25 = arith.constant 0 : index
    %35 = vector.load %arg10[%c0_24, %c0_25] : memref<16x128xf32, #tpu.memory_space<vmem>>, vector<16x128xf32>
    tpu.vector_store %arg10[%c0_24, %c0_25], %34 {strides = array<i32>} : memref<16x128xf32, #tpu.memory_space<vmem>>, vector<16x128xf32>,
    return
  }
  func.func @transform_0(%arg0: i32) -> (i32, i32) {
    %c0_i32 = arith.constant 0 : i32
    %c0_i32_0 = arith.constant 0 : i32
    return %arg0, %c0_i32 : i32, i32
  }
  func.func @transform_1(%arg0: i32) -> (i32, i32) {
    %c0_i32 = arith.constant 0 : i32
    %c0_i32_0 = arith.constant 0 : i32
    return %arg0, %c0_i32 : i32, i32
  }
  func.func @transform_2(%arg0: i32) -> (i32, i32) {
    %c0_i32 = arith.constant 0 : i32
    %c0_i32_0 = arith.constant 0 : i32
    %c0_i32_1 = arith.constant 0 : i32
    return %c0_i32, %c0_i32_0 : i32, i32
  }
  func.func @transform_3(%arg0: i32) -> (i32, i32) {
    %c0_i32 = arith.constant 0 : i32
    %c0_i32_0 = arith.constant 0 : i32
    %c0_i32_1 = arith.constant 0 : i32
    return %c0_i32, %c0_i32_0 : i32, i32
  }
  func.func @transform_4(%arg0: i32) -> (i32, i32) {
    %c0_i32 = arith.constant 0 : i32
    %c0_i32_0 = arith.constant 0 : i32
    %c0_i32_1 = arith.constant 0 : i32
    return %c0_i32, %c0_i32_0 : i32, i32
  }
  func.func @transform_5(%arg0: i32) -> (i32, i32) {
    %c0_i32 = arith.constant 0 : i32
    %c0_i32_0 = arith.constant 0 : i32
    %c0_i32_1 = arith.constant 0 : i32
    return %c0_i32, %c0_i32_0 : i32, i32
  }
  func.func @transform_6(%arg0: i32) -> (i32, i32) {
    %c0_i32 = arith.constant 0 : i32
    %c0_i32_0 = arith.constant 0 : i32
    %c0_i32_1 = arith.constant 0 : i32
    return %c0_i32, %c0_i32_0 : i32, i32
  }
  func.func @transform_7(%arg0: i32) -> (i32, i32) {
    %c0_i32 = arith.constant 0 : i32
    %c0_i32_0 = arith.constant 0 : i32
    %c0_i32_1 = arith.constant 0 : i32
    return %c0_i32, %c0_i32_0 : i32, i32
  }
  func.func @transform_8(%arg0: i32) -> (i32, i32) {
    %c0_i32 = arith.constant 0 : i32
    %c0_i32_0 = arith.constant 0 : i32
    %c0_i32_1 = arith.constant 0 : i32
    return %c0_i32, %c0_i32_0 : i32, i32
  }
  func.func @transform_9(%arg0: i32) -> (i32, i32) {
    %c0_i32 = arith.constant 0 : i32
    %c0_i32_0 = arith.constant 0 : i32
    return %arg0, %c0_i32 : i32, i32
  }
}

</mosaic_0001>

<bundles_post_ra>
// kernel: tpu_custom_call.1
= control target key start
LH: loop header
LB: loop body
LE: loop exit
PB: predicated region body
PF: predicated region fallthrough
CT: control target
= control target key end

     0   :  { %14 = vsyncpa [#allocation3], 0  ;;  %s1201_s0 = inlined_call_operand.hbm [shape: bf16[16,32], index: 0, kind: input, shape index: {}]   ;;  %s1202_s1 = inlined_call_operand.hbm [shape: bf16[16,32], index: 1, kind: input, shape index: {}]   ;;  %s1203_s2 = inlined_call_operand.hbm [shape: bf16[32,256], index: 2, kind: input, shape index: {}]   ;;  %s1204_s3 = inlined_call_operand.hbm [shape: bf16[32,256], index: 3, kind: input, shape index: {}]   ;;  %s1205_s4 = inlined_call_operand.vmem [shape: f32[1,256], index: 4, kind: input, shape index: {}]   ;;  %s1206_s5 = inlined_call_operand.hbm [shape: bf16[256,256], index: 5, kind: input, shape index: {}]   ;;  %s1207_s6 = inlined_call_operand.vmem [shape: f32[1,256], index: 6, kind: input, shape index: {}]   ;;  %s1208_s7 = inlined_call_operand.hbm [shape: bf16[256,128], index: 7, kind: input, shape index: {}]   ;;  %s1209_s8 = inlined_call_operand.vmem [shape: f32[1,128], index: 8, kind: input, shape index: {}]   ;;  %s1210_s9 = inlined_call_operand.hbm [shape: f32[16,128], index: 9, kind: output, shape index: {}]  }
   0x1   :  { %15 = vsyncpa [#allocation6], 0 }
   0x2   :  { %16 = vsyncpa [#allocation9], 0 }
   0x3   :  { %17 = vsyncpa [#allocation12], 0 }
   0x4   :  { %18 = vsyncpa [#allocation4], 0  ;;  %s1084_s30 = smov [#allocation5]  }
   0x5   :  { %s36_s10 = sshll.u32 %s1084_s30, 4  ;;  %s37_s10 = int_to_ptr.vmem [resolvable:$true] %s36_s10 }
   0x6   :  { %s942_s11 = scalar_lea.vmem %s37_s10, 128  ;;  %p947_p1 = scmp.lt.s32.totalorder %s37_s10, %s37_s10 }
   0x7   :  { %p943_p0 = scmp.ne.s32.totalorder %s37_s10, %s942_s11  ;;  %p948_p2 = scmp.lt.s32.totalorder %s942_s11, %s942_s11 }
   0x9   :  { %p949_p3 = por %p948_p2, %p947_p1 }
   0xb   :  { %p950_p4 = pnand %p949_p3, %p943_p0 }
   0xd   :  { %953 = shalt.err (!%p950_p4)
}
   0xe   :  { %s1085_s12 = smov 64   ;;  %s1086_s13 = smov 4  }
   0xf   :  { %42 = dma.hbm_to_vmem [thread:$0]  %s1202_s1, 128, %s37_s10, [#allocation6], %s1085_s12, %s1085_s12, %s1086_s13  }
  0x10   :  { %s1087_s16 = smov [#allocation8]   ;;  %s1088_s18 = smov [#allocation2]  }
  0x11   :  { %s60_s17 = sshll.u32 %s1087_s16, 4  ;;  %s24_s19 = sshll.u32 %s1088_s18, 4  ;;  %s61_s17 = int_to_ptr.vmem [resolvable:$true] %s60_s17  ;;  %s25_s19 = int_to_ptr.vmem [resolvable:$true] %s24_s19 }
  0x12   :  { %s962_s20 = scalar_lea.vmem %s61_s17, 512  ;;  %p967_p6 = scmp.lt.s32.totalorder %s61_s17, %s61_s17 }
  0x13   :  { %p963_p5 = scmp.ne.s32.totalorder %s61_s17, %s962_s20  ;;  %p968_p7 = scmp.lt.s32.totalorder %s962_s20, %s962_s20 }
  0x15   :  { %p969_p8 = por %p968_p7, %p967_p6 }
  0x17   :  { %p970_p9 = pnand %p969_p8, %p963_p5 }
  0x19   :  { %973 = shalt.err (!%p970_p9)
}
  0x1a   :  { %s1089_s21 = smov 128   ;;  %s1090_s22 = smov 8  }
  0x1b   :  { %66 = dma.hbm_to_vmem [thread:$0]  %s1204_s3, 512, %s61_s17, [#allocation9], %s1089_s21, %s1089_s21, %s1090_s22  }
  0x1c   :  { %s982_s1 = scalar_lea.vmem %s25_s19, 128  ;;  %p987_p11 = scmp.lt.s32.totalorder %s25_s19, %s25_s19 }
  0x1d   :  { %p983_p10 = scmp.ne.s32.totalorder %s25_s19, %s982_s1  ;;  %p988_p12 = scmp.lt.s32.totalorder %s982_s1, %s982_s1 }
  0x1f   :  { %p989_p13 = por %p988_p12, %p987_p11 }
  0x21   :  { %p990_p0 = pnand %p989_p13, %p983_p10 }
  0x23   :  { %993 = shalt.err (!%p990_p0)
}
  0x24   :  { %30 = dma.hbm_to_vmem [thread:$0]  %s1201_s0, 128, %s25_s19, [#allocation3], %s1085_s12, %s1085_s12, %s1086_s13  }
  0x25   :  { %s1091_s27 = smov [#allocation7]   ;;  %s1092_s29 = smov [#allocation10]  }
  0x26   :  { %s48_s28 = sshll.u32 %s1091_s27, 4  ;;  %s74_s3 = sshll.u32 %s1092_s29, 4  ;;  %s49_s28 = int_to_ptr.vmem [resolvable:$true] %s48_s28  ;;  %s75_s3 = int_to_ptr.vmem [resolvable:$true] %s74_s3 }
  0x27   :  { %s1002_s30 = scalar_lea.vmem %s49_s28, 512  ;;  %p1007_p2 = scmp.lt.s32.totalorder %s49_s28, %s49_s28 }
  0x28   :  { %p1003_p1 = scmp.ne.s32.totalorder %s49_s28, %s1002_s30  ;;  %p1008_p3 = scmp.lt.s32.totalorder %s1002_s30, %s1002_s30 }
  0x2a   :  { %p1009_p4 = por %p1008_p3, %p1007_p2 }
  0x2c   :  { %p1010_p5 = pnand %p1009_p4, %p1003_p1 }
  0x2e   :  { %1013 = shalt.err (!%p1010_p5)
}
  0x2f   :  { %54 = dma.hbm_to_vmem [thread:$0]  %s1203_s2, 512, %s49_s28, [#allocation6], %s1089_s21, %s1089_s21, %s1090_s22  }
  0x30   :  { %s1022_s0 = scalar_lea.vmem %s75_s3, 4096  ;;  %p1027_p7 = scmp.lt.s32.totalorder %s75_s3, %s75_s3 }
  0x31   :  { %p1023_p6 = scmp.ne.s32.totalorder %s75_s3, %s1022_s0  ;;  %p1028_p8 = scmp.lt.s32.totalorder %s1022_s0, %s1022_s0 }
  0x33   :  { %p1029_p9 = por %p1028_p8, %p1027_p7 }
  0x35   :  { %p1030_p10 = pnand %p1029_p9, %p1023_p6 }
  0x37   :  { %1033 = shalt.err (!%p1030_p10)
}
  0x38   :  { %80 = dma.hbm_to_vmem [thread:$0]  %s1206_s5, 4096, %s75_s3, [#allocation9], %s1089_s21, %s1089_s21, %s1090_s22  }
  0x39   :  { %s1093_s16 = smov [#allocation11]  }
  0x3a   :  { %s88_s17 = sshll.u32 %s1093_s16, 4  ;;  %s89_s17 = int_to_ptr.vmem [resolvable:$true] %s88_s17 }
  0x3b   :  { %s1042_s18 = scalar_lea.vmem %s89_s17, 2048  ;;  %p1047_p12 = scmp.lt.s32.totalorder %s89_s17, %s89_s17 }
  0x3c   :  { %p1043_p11 = scmp.ne.s32.totalorder %s89_s17, %s1042_s18  ;;  %p1048_p13 = scmp.lt.s32.totalorder %s1042_s18, %s1042_s18 }
  0x3e   :  { %p1049_p0 = por %p1048_p13, %p1047_p12 }
  0x40   :  { %p1050_p1 = pnand %p1049_p0, %p1043_p11 }
  0x42   :  { %1053 = shalt.err (!%p1050_p1)
}
  0x43   :  { %94 = dma.hbm_to_vmem [thread:$0]  %s1208_s7, 2048, %s89_s17, [#allocation12], %s1085_s12, %s1085_s12, %s1086_s13  }
  0x44   :  { %1074 = dma.done.wait [#allocation3], 128  }
  0x45   :  { %1075 = vsyncadd [#allocation3], 4294967168 }
  0x46   :  { %1076 = dma.done.wait [#allocation6], 640  }
  0x47   :  { %1077 = vsyncadd [#allocation6], 4294966656 }
  0x48   :  { %1078 = dma.done.wait [#allocation9], 4608  }
  0x49   :  { %1079 = vsyncadd [#allocation9], 4294962688 }
  0x4a   :  { %1080 = dma.done.wait [#allocation12], 2048  }
  0x4b   :  { %1081 = vsyncadd [#allocation12], 4294965248  ;;  %v1094_v0 = vmov 0   ;;  %v852_v1 = vld [vmem:[#allocation8 + $0x14] ss:$8 sps:$4 sm:$0xff]   ;;  %vm153_vm0 = vcmask 261120   ;;  %v273_v54 = vlaneseq }
  0x4c   :  { %189 = vmatprep.mubr.bf16.mxu1 %v1094_v0  ;;  %v854_v2 = vld [vmem:[#allocation8 + $0x10] ss:$8 sps:$4 sm:$0xff]   ;;  %169 = vmatprep.subr.bf16.mxu1 %v852_v1  ;;  %v855_v3 = vld [vmem:[#allocation8 + $0x4] ss:$8 sps:$4 sm:$0xff]   ;;  %v857_v4 = vld [vmem:[#allocation8] ss:$8 sps:$4 sm:$0xff]  }
  0x4d   :  { %170 = vmatpush1.bf16.msra.mxu1 %v854_v2  ;;  %v861_v5 = vld [vmem:[#allocation7 + $0x14] ss:$8 sps:$4 sm:$0xff]   ;;  %v859_v7 = vld [vmem:[#allocation7 + $0x10] ss:$8 sps:$4 sm:$0xff]   ;;  %v864_v8 = vld [vmem:[#allocation7 + $0x4] ss:$8 sps:$4 sm:$0xff]  }
  0x4e   :  { %171 = vmatprep.subr.bf16.mxu1 %v855_v3  ;;  %v858_v6 = vld [vmem:[#allocation5] sm:$0xff]   ;;  %v869_v11 = vld [vmem:[#allocation10 + $0x64] ss:$8 sps:$4 sm:$0xff]   ;;  %v862_v12 = vld [vmem:[#allocation7] ss:$8 sps:$4 sm:$0xff]   ;;  %v274_v57 = vshrl.u32 %v273_v54, 7 }
  0x4f   :  { %v866_v9 = vld [vmem:[#allocation10 + $0x74] ss:$8 sps:$4 sm:$0xff]   ;;  %v868_v10 = vld [vmem:[#allocation10 + $0x70] ss:$8 sps:$4 sm:$0xff]   ;;  %v871_v13 = vld [vmem:[#allocation10 + $0x60] ss:$8 sps:$4 sm:$0xff]  }
  0x50   :  { %497 = vmatprep.subr.bf16.mxu0 %v866_v9  ;;  %v872_v14 = vld [vmem:[#allocation10 + $0x54] ss:$8 sps:$4 sm:$0xff]   ;;  %v874_v16 = vld [vmem:[#allocation10 + $0x50] ss:$8 sps:$4 sm:$0xff]   ;;  %v875_v17 = vld [vmem:[#allocation10 + $0x44] ss:$8 sps:$4 sm:$0xff]  }
  0x51   :  { %172 = vmatpush1.bf16.msra.mxu1 %v857_v4  ;;  %498 = vmatpush1.bf16.msra.mxu0 %v868_v10  ;;  %v865_v15 = vld [vmem:[#allocation2] sm:$0xff]   ;;  %v877_v18 = vld [vmem:[#allocation10 + $0x40] ss:$8 sps:$4 sm:$0xff]   ;;  %v881_v21 = vld [vmem:[#allocation10 + $0x24] ss:$8 sps:$4 sm:$0xff]   ;;  %v279_v59 = vsub.s32 1, %v274_v57 }
  0x52   :  { %240 = vmatprep.subr.bf16.mxu1 %v861_v5  ;;  %499 = vmatprep.subr.bf16.mxu0 %v869_v11  ;;  %v878_v19 = vld [vmem:[#allocation10 + $0x34] ss:$8 sps:$4 sm:$0xff]   ;;  %v880_v20 = vld [vmem:[#allocation10 + $0x30] ss:$8 sps:$4 sm:$0xff]   ;;  %v883_v22 = vld [vmem:[#allocation10 + $0x20] ss:$8 sps:$4 sm:$0xff]  }
  0x53   :  { %v884_v23 = vld [vmem:[#allocation10 + $0x14] ss:$8 sps:$4 sm:$0xff]   ;;  %v886_v24 = vld [vmem:[#allocation10 + $0x10] ss:$8 sps:$4 sm:$0xff]   ;;  %v887_v25 = vld [vmem:[#allocation10 + $0x4] ss:$8 sps:$4 sm:$0xff]  }
  0x54   :  { %762 = vmatmul.mubr.msk.bf16.vlgmr.msra.gmra.mxu1 %vm153_vm0, %v858_v6  ;;  %v889_v26 = vld [vmem:[#allocation10] ss:$8 sps:$4 sm:$0xff]   ;;  %v890_v27 = vld [vmem:[#allocation10 + $0xf4] ss:$8 sps:$4 sm:$0xff]   ;;  %v892_v28 = vld [vmem:[#allocation10 + $0xf0] ss:$8 sps:$4 sm:$0xff]  }
  0x55   :  { %241 = vmatpush1.bf16.msra.mxu1 %v859_v7  ;;  %260 = vmatprep.mubr.bf16.mxu1 %v1094_v0  ;;  %v893_v29 = vld [vmem:[#allocation10 + $0xe4] ss:$8 sps:$4 sm:$0xff]   ;;  %v895_v30 = vld [vmem:[#allocation10 + $0xe0] ss:$8 sps:$4 sm:$0xff]   ;;  %v896_v31 = vld [vmem:[#allocation10 + $0xd4] ss:$8 sps:$4 sm:$0xff]  }
  0x56   :  { %242 = vmatprep.subr.bf16.mxu1 %v864_v8  ;;  %500 = vmatpush1.bf16.msra.mxu0 %v871_v13  ;;  %v898_v32 = vld [vmem:[#allocation10 + $0xd0] ss:$8 sps:$4 sm:$0xff]   ;;  %v899_v33 = vld [vmem:[#allocation10 + $0xc4] ss:$8 sps:$4 sm:$0xff]   ;;  %v901_v34 = vld [vmem:[#allocation10 + $0xc0] ss:$8 sps:$4 sm:$0xff]  }
  0x57   :  { %501 = vmatprep.subr.bf16.mxu0 %v872_v14  ;;  %v902_v35 = vld [vmem:[#allocation10 + $0xb4] ss:$8 sps:$4 sm:$0xff]   ;;  %v904_v36 = vld [vmem:[#allocation10 + $0xb0] ss:$8 sps:$4 sm:$0xff]   ;;  %v905_v37 = vld [vmem:[#allocation10 + $0xa4] ss:$8 sps:$4 sm:$0xff]  }
  0x58   :  { %v907_v38 = vld [vmem:[#allocation10 + $0xa0] ss:$8 sps:$4 sm:$0xff]   ;;  %v908_v39 = vld [vmem:[#allocation10 + $0x94] ss:$8 sps:$4 sm:$0xff]   ;;  %v910_v40 = vld [vmem:[#allocation10 + $0x90] ss:$8 sps:$4 sm:$0xff]  }
  0x59   :  { %243 = vmatpush1.bf16.msra.mxu1 %v862_v12  ;;  %v911_v41 = vld [vmem:[#allocation10 + $0x84] ss:$8 sps:$4 sm:$0xff]   ;;  %v913_v42 = vld [vmem:[#allocation10 + $0x80] ss:$8 sps:$4 sm:$0xff]   ;;  %v914_v43 = vld [vmem:[#allocation11 + $0x78] sm:$0xff]   ;;  %v275_v61 = vsub.s32 0, %v274_v57 }
  0x5a   :  { %502 = vmatpush1.bf16.msra.mxu0 %v874_v16  ;;  %v915_v44 = vld [vmem:[#allocation11 + $0x38] sm:$0xff]   ;;  %v916_v45 = vld [vmem:[#allocation11 + $0x70] sm:$0xff]   ;;  %818 = vmatprep.subr.bf16.mxu1 %v914_v43  ;;  %v918_v47 = vld [vmem:[#allocation11 + $0x68] sm:$0xff]   ;;  %v723_v57 = vand.u32 127, %v273_v54 }
  0x5b   :  { %503 = vmatprep.subr.bf16.mxu0 %v875_v17  ;;  %v917_v46 = vld [vmem:[#allocation11 + $0x30] sm:$0xff]   ;;  %v919_v48 = vld [vmem:[#allocation11 + $0x28] sm:$0xff]   ;;  %v920_v49 = vld [vmem:[#allocation11 + $0x60] sm:$0xff]  }
  0x5c   :  { %768 = vmatmul.mubr.msk.bf16.vlgmr.msra.gmra.mxu1 %vm153_vm0, %v865_v15  ;;  %v921_v50 = vld [vmem:[#allocation11 + $0x20] sm:$0xff]   ;;  %v922_v51 = vld [vmem:[#allocation11 + $0x58] sm:$0xff]   ;;  %v271_v62 = vld [vmem:[%s1205_s4] sm:$0x3]  ;;  %vm732_vm1 = vcmp.ge.s32.totalorder %v723_v57, 32 }
  0x5d   :  { %819 = vmatpush3.bf16.msra.mxu1 %v915_v44  ;;  %v923_v52 = vld [vmem:[#allocation11 + $0x18] sm:$0xff]   ;;  %v280_v1 = vrot.slane %v271_v62, %v279_v59  ;;  %v276_v3 = vrot.slane %v271_v62, %v275_v61 }
  0x5e   :  { %504 = vmatpush1.bf16.msra.mxu0 %v877_v18  ;;  %820 = vmatprep.subr.bf16.mxu1 %v916_v45  ;;  %v924_v18 = vld [vmem:[#allocation11 + $0x50] sm:$0xff]  }
  0x5f   :  { %505 = vmatprep.subr.bf16.mxu0 %v878_v19  ;;  %v925_v19 = vld [vmem:[#allocation11 + $0x10] sm:$0xff]  }
  0x61   :  { %821 = vmatpush3.bf16.msra.mxu1 %v917_v46 }
  0x62   :  { %506 = vmatpush1.bf16.msra.mxu0 %v880_v20  ;;  %822 = vmatprep.subr.bf16.mxu1 %v918_v47  ;;  %v926_v20 = vld [vmem:[#allocation11 + $0x48] sm:$0xff]  }
  0x63   :  { %507 = vmatprep.subr.bf16.mxu0 %v881_v21  ;;  %v927_v21 = vld [vmem:[#allocation11 + $0x8] sm:$0xff]  }
  0x65   :  { %823 = vmatpush3.bf16.msra.mxu1 %v919_v48 }
  0x66   :  { %508 = vmatpush1.bf16.msra.mxu0 %v883_v22  ;;  %824 = vmatprep.subr.bf16.mxu1 %v920_v49  ;;  %v928_v22 = vld [vmem:[#allocation11 + $0x40] sm:$0xff]  }
  0x67   :  { %509 = vmatprep.subr.bf16.mxu0 %v884_v23  ;;  %v929_v23 = vld [vmem:[#allocation11] sm:$0xff]  }
  0x69   :  { %825 = vmatpush3.bf16.msra.mxu1 %v921_v50 }
  0x6a   :  { %510 = vmatpush1.bf16.msra.mxu0 %v886_v24  ;;  %826 = vmatprep.subr.bf16.mxu1 %v922_v51  ;;  %v325_v24 = vld [vmem:[%s1207_s6] sm:$0x3] }
  0x6b   :  { %511 = vmatprep.subr.bf16.mxu0 %v887_v25 }
  0x6d   :  { %827 = vmatpush3.bf16.msra.mxu1 %v923_v52 }
  0x6e   :  { %512 = vmatpush1.bf16.msra.mxu0 %v889_v26  ;;  %828 = vmatprep.subr.bf16.mxu1 %v924_v18  ;;  %v334_v26 = vrot.slane %v325_v24, %v279_v59 }
  0x6f   :  { %513 = vmatprep.subr.bf16.mxu0 %v890_v27  ;;  %v330_v27 = vrot.slane %v325_v24, %v275_v61 }
  0x71   :  { %829 = vmatpush3.bf16.msra.mxu1 %v925_v19 }
  0x72   :  { %514 = vmatpush2.bf16.msra.mxu0 %v892_v28  ;;  %830 = vmatprep.subr.bf16.mxu1 %v926_v20 }
  0x73   :  { %515 = vmatprep.subr.bf16.mxu0 %v893_v29 }
  0x75   :  { %831 = vmatpush3.bf16.msra.mxu1 %v927_v21 }
  0x76   :  { %516 = vmatpush2.bf16.msra.mxu0 %v895_v30  ;;  %832 = vmatprep.subr.bf16.mxu1 %v928_v22 }
  0x77   :  { %517 = vmatprep.subr.bf16.mxu0 %v896_v31 }
  0x79   :  { %833 = vmatpush3.bf16.msra.mxu1 %v929_v23 }
  0x7a   :  { %518 = vmatpush2.bf16.msra.mxu0 %v898_v32 }
  0x7b   :  { %519 = vmatprep.subr.bf16.mxu0 %v899_v33 }
  0x7e   :  { %520 = vmatpush2.bf16.msra.mxu0 %v901_v34 }
  0x7f   :  { %521 = vmatprep.subr.bf16.mxu0 %v902_v35 }
  0x82   :  { %522 = vmatpush2.bf16.msra.mxu0 %v904_v36 }
  0x83   :  { %523 = vmatprep.subr.bf16.mxu0 %v905_v37 }
  0x86   :  { %524 = vmatpush2.bf16.msra.mxu0 %v907_v38 }
  0x87   :  { %525 = vmatprep.subr.bf16.mxu0 %v908_v39 }
  0x8a   :  { %526 = vmatpush2.bf16.msra.mxu0 %v910_v40 }
  0x8b   :  { %527 = vmatprep.subr.bf16.mxu0 %v911_v41 }
  0x8e   :  { %528 = vmatpush2.bf16.msra.mxu0 %v913_v42  ;;  %v801_v42 = vld [vmem:[%s1209_s8] ss:$0 sm:$0xff]  ;;  %s1095_s8 = smov [#allocation13]  }
  0x8f   :  { %s742_s20 = sshll.u32 %s1095_s8, 4  ;;  %s743_s20 = int_to_ptr.vmem [resolvable:$true] %s742_s20 }
  0x90   :  { %s1054_s23 = scalar_lea.vmem %s743_s20, 256  ;;  %p1059_p3 = scmp.lt.s32.totalorder %s743_s20, %s743_s20 }
  0x91   :  { %p1055_p2 = scmp.ne.s32.totalorder %s743_s20, %s1054_s23  ;;  %p1060_p4 = scmp.lt.s32.totalorder %s1054_s23, %s1054_s23 }
  0x93   :  { %p1061_p5 = por %p1060_p4, %p1059_p3 }
  0x95   :  { %p1062_p6 = pnand %p1061_p5, %p1055_p2 }
 0x114   :  { %v191_v53 = vpop.f32.mrf.mxu1 }
 0x116   :  { %v193_v55 = vpop.f32.mrf.mxu1 }
 0x118   :  { %v195_v56 = vpop.f32.mrf.mxu1 }
 0x11a   :  { %v197_v58 = vpop.f32.mrf.mxu1 }
 0x11c   :  { %v262_v60 = vpop.f32.mrf.mxu1 }
 0x11d   :  { %v263_v2 = vadd.f32 %v262_v60, %v191_v53 }
 0x11e   :  { %v264_v63 = vpop.f32.mrf.mxu1 }
 0x11f   :  { %v265_v0 = vadd.f32 %v264_v63, %v193_v55  ;;  %v283_v10 = vadd.f32 %v276_v3, %v263_v2 }
 0x120   :  { %v266_v4 = vpop.f32.mrf.mxu1 }
 0x121   :  { %v267_v5 = vadd.f32 %v266_v4, %v195_v56  ;;  %v284_v9 = vadd.f32 %v280_v1, %v265_v0  ;;  %v287_v15 = vmax.f32 %v283_v10, 0.0 }
 0x122   :  { %v268_v6 = vpop.f32.mrf.mxu1 }
 0x123   :  { %v285_v7 = vadd.f32 %v276_v3, %v267_v5  ;;  %v269_v8 = vadd.f32 %v268_v6, %v197_v58  ;;  %v288_v13 = vmax.f32 %v284_v9, 0.0 }
 0x125   :  { %v286_v11 = vadd.f32 %v280_v1, %v269_v8  ;;  %v289_v12 = vmax.f32 %v285_v7, 0.0 }
 0x127   :  { %v290_v14 = vmax.f32 %v286_v11, 0.0  ;;  %v291_v17 = vpack.c.bf16 %v289_v12, %v287_v15 }
 0x129   :  { %v292_v16 = vpack.c.bf16 %v290_v14, %v288_v13 }
 0x12b   :  { %529 = vmatprep.mubr.bf16.mxu0 %v292_v16 }
 0x12c   :  { %530 = vmatmul.mubr.bf16.vlgmr.msra.gmra.mxu0 %v291_v17 }
 0x1ec   :  { %v531_v25 = vpop.f32.mrf.mxu0 }
 0x1ed   :  { %v532_v32 = vadd.f32 %v531_v25, %v330_v27 }
 0x1ee   :  { %v533_v28 = vpop.f32.mrf.mxu0 }
 0x1ef   :  { %v534_v30 = vadd.f32 %v533_v28, %v334_v26  ;;  %v540_v38 = vmax.f32 %v532_v32, 0.0 }
 0x1f0   :  { %v535_v29 = vpop.f32.mrf.mxu0 }
 0x1f1   :  { %v536_v31 = vadd.f32 %v535_v29, %v330_v27  ;;  %v541_v36 = vmax.f32 %v534_v30, 0.0 }
 0x1f2   :  { %v537_v33 = vpop.f32.mrf.mxu0 }
 0x1f3   :  { %v538_v34 = vadd.f32 %v537_v33, %v334_v26  ;;  %v542_v35 = vmax.f32 %v536_v31, 0.0 }
 0x1f5   :  { %v543_v37 = vmax.f32 %v538_v34, 0.0  ;;  %v544_v40 = vpack.c.bf16 %v542_v35, %v540_v38 }
 0x1f7   :  { %v545_v39 = vpack.c.bf16 %v543_v37, %v541_v36 }
 0x1f9   :  { %713 = vmatprep.mubr.bf16.mxu1 %v545_v39 }
 0x1fa   :  { %714 = vmatmul.mubr.bf16.vlgmr.msra.gmra.mxu1 %v544_v40 }
 0x2ba   :  { %v834_v41 = vpop.f32.mrf.mxu1 }
 0x2bc   :  { %v835_v43 = vpop.f32.mrf.mxu1 }
 0x2bd   :  { %v836_v44 = vadd.f32 %v835_v43, %v834_v41 }
 0x2be   :  { %v837_v45 = vpop.f32.mrf.mxu1 }
 0x2bf   :  { %v716_v46 = vadd.f32 %v836_v44, %v801_v42 }
 0x2c0   :  { %v838_v47 = vpop.f32.mrf.mxu1 }
 0x2c1   :  { %v724_v48 = vmax.f32 %v716_v46, -20.0  ;;  %v839_v49 = vadd.f32 %v838_v47, %v837_v45 }
 0x2c3   :  { %v726_v50 = vmin.f32 %v724_v48, 2.0  ;;  %v719_v51 = vadd.f32 %v839_v49, %v801_v42 }
 0x2c5   :  { %v728_v52 = vmul.f32 1.442695, %v726_v50  ;;  %v725_v53 = vmax.f32 %v719_v51, -20.0 }
 0x2c7   :  { %930 = vpow2.f32 %v728_v52  ;;  %v727_v55 = vmin.f32 %v725_v53, 2.0 }
 0x2c9   :  { %v730_v56 = vmul.f32 1.442695, %v727_v55 }
 0x2cb   :  { %932 = vpow2.f32 %v730_v56 }
 0x2d4   :  { %v931_v58 = vpop.eup %930 }
 0x2d5   :  { %v733_v59 = vsel %vm732_vm1, %v931_v58, %v716_v46 }
 0x2d6   :  { %735 = vst [vmem:[#allocation13] sm:$0xff] %v733_v59 }
 0x2d8   :  { %v933_v60 = vpop.eup %932 }
 0x2d9   :  { %v734_v61 = vsel %vm732_vm1, %v933_v60, %v719_v51 }
 0x2da   :  { %736 = vst [vmem:[#allocation13 + $0x8] sm:$0xff] %v734_v61 }
 0x2db   :  { %1065 = shalt.err (!%p1062_p6)
}
 0x2dc   :  { %748 = dma.vmem_to_hbm [thread:$0]  %s743_s20, 256, %s1210_s9, [#allocation4], %s1089_s21, %s1089_s21, %s1090_s22  }
 0x2dd   :  { %1082 = dma.done.wait [#allocation4], 256  }
 0x2de   :  { %1083 = vsyncadd [#allocation4], 4294967040 }
 0x2df   :  { %752 = vsyncpa [#allocation3], 1 }
 0x2e0   :  { %753 = vsyncpa [#allocation6], 1 }
 0x2e1   :  { %754 = vsyncpa [#allocation9], 1 }
 0x2e2   :  { %755 = vsyncpa [#allocation12], 1 }
 0x2e3   :  { %756 = vsyncpa [#allocation4], 1 }

</bundles_post_ra>
